<compile_context>
chip_gen: v5e
topology: v5e:2x2
jax: 0.10.0
libtpu: 0.0.40
codegen_flags: <defaults>
</compile_context>

<pallas_src>
import jax
import jax.numpy as jnp
from jax.experimental import pallas as pl
from jax.experimental.pallas import tpu as pltpu


def _round_up(x, m):
    return ((x + m - 1) // m) * m


def _linear_kernel(x_ref, w_ref, b_ref, o_ref):
    """x_ref: VMEM (tm, L) f32, w_ref: VMEM (L, Np) f32, b_ref: VMEM (1, Np) f32,
    o_ref: VMEM (tm, Np) f32."""
    acc = jnp.dot(x_ref[...], w_ref[...], preferred_element_type=jnp.float32)
    o_ref[...] = (acc + b_ref[...]).astype(o_ref.dtype)


def _linear_pallas(xp, w_bd, b_bd):
    """xp: (R, L) lane-packed rows, w_bd: (L, Np), b_bd: (1, Np) -> (R, Np)."""
    R, L = xp.shape
    Np = w_bd.shape[1]

    # Up to 1024 packed rows per tile (1024 x 128 f32 = 512 KiB x tile; ~2 MiB
    # total with double-buffered in+out — far under scoped VMEM on all chips).
    # Keep >= 2 grid steps when R is large enough so the "parallel" axis can be
    # sharded across v7x's two TensorCores.
    TM_MAX = 1024
    if R <= 16:
        tm = R
    else:
        tm = min(TM_MAX, _round_up(pl.cdiv(R, 2), 8))
    grid = (pl.cdiv(R, tm),)

    cost = pl.CostEstimate(
        flops=2 * R * L * Np,
        transcendentals=0,
        bytes_accessed=4 * (R * L + L * Np + Np + R * Np),
    )

    return pl.pallas_call(
        _linear_kernel,
        out_shape=jax.ShapeDtypeStruct((R, Np), xp.dtype),
        grid=grid,
        in_specs=[
            pl.BlockSpec((tm, L), lambda i: (i, 0)),   # packed x tile
            pl.BlockSpec((L, Np), lambda i: (0, 0)),   # block-diag weight (resident)
            pl.BlockSpec((1, Np), lambda i: (0, 0)),   # tiled bias (resident)
        ],
        out_specs=pl.BlockSpec((tm, Np), lambda i: (i, 0)),
        compiler_params=pltpu.CompilerParams(
            dimension_semantics=("parallel",),
        ),
        cost_estimate=cost,
    )(xp, w_bd, b_bd)


class EnergyProfiledLinear:
    """JAX analogue of EnergyProfiledModule wrapping nn.Linear.

    Weight/bias are prepared once at construction:
      - w_t  : (in, out) plain transpose (used by the small-M fused path)
      - w_bd : (pack*in, pack*out) block-diagonal lane-dense weight
      - b_bd : (1, pack*out) tiled bias
    """

    def __init__(self, weight, bias, name=None, enabled=True,
                 min_rows_for_pallas=1024):
        weight = jnp.asarray(weight, dtype=jnp.float32)   # PyTorch layout (out, in)
        bias = jnp.asarray(bias, dtype=jnp.float32)       # (out,)
        self.out_features, self.in_features = weight.shape
        K, N = self.in_features, self.out_features

        self.w_t = jnp.transpose(weight)                  # (K, N)
        self.b = bias

        # Lane-dense pack factor: pack P rows of x into one 128-lane vreg row.
        P = 128 // K if (K < 128 and 128 % K == 0) else 1
        self.pack = P
        if P > 1:
            self.w_bd = jax.scipy.linalg.block_diag(*([self.w_t] * P))  # (P*K, P*N)
            self.b_bd = jnp.tile(bias.reshape(1, N), (1, P))            # (1, P*N)
        else:
            self.w_bd = self.w_t
            self.b_bd = bias.reshape(1, N)

        self.name = name
        self.enabled = enabled
        self.min_rows_for_pallas = min_rows_for_pallas

    def __call__(self, x):
        out_shape = (*x.shape[:-1], self.out_features)
        if not self.enabled:
            # Disabled path: zeros with the original output shape/dtype —
            # statically known, so no kernel launch and no HBM traffic.
            return jnp.zeros(out_shape, dtype=x.dtype)

        x2d = jnp.asarray(x, dtype=jnp.float32).reshape(-1, self.in_features)
        M = x2d.shape[0]

        if M < self.min_rows_for_pallas:
            # Small-M fast path: a Pallas launch costs more than the GEMM;
            # let XLA fuse it with neighbors.
            out2d = x2d @ self.w_t + self.b
            return out2d.reshape(out_shape).astype(x.dtype)

        P = self.pack
        # Pad rows so packed rows are a multiple of 8 (sublane alignment).
        M_pad = _round_up(M, P * 8)
        if M_pad != M:
            x2d = jnp.pad(x2d, ((0, M_pad - M), (0, 0)))
        xp = x2d.reshape(M_pad // P, P * self.in_features)   # free, row-major
        outp = _linear_pallas(xp, self.w_bd, self.b_bd)      # (M_pad/P, P*N)
        out2d = outp.reshape(M_pad, self.out_features)[:M]
        return out2d.reshape(out_shape).astype(x.dtype)

    def __repr__(self):
        status = "enabled" if self.enabled else "disabled"
        return f"EnergyProfiledModule({self.name}, {status})"


if __name__ == "__main__":
    IN, OUT = 32, 32
    key = jax.random.PRNGKey(0)
    kx1, kx2, kw, kb = jax.random.split(key, 4)

    weight = jax.random.normal(kw, (OUT, IN), dtype=jnp.float32) * 0.1  # torch layout
    bias = jax.random.normal(kb, (OUT,), dtype=jnp.float32) * 0.1

    def ref(x):
        return jnp.einsum("...k,nk->...n", x, weight) + bias

    # 1) Tiny input (batch=2, seq=8, hidden=32): default module takes the fused
    #    small-M fast path.
    x_small = jax.random.normal(kx1, (2, 8, IN), dtype=jnp.float32)
    mod = EnergyProfiledLinear(weight, bias, name="linear", enabled=True)
    y_small = jax.block_until_ready(mod(x_small))
    assert y_small.shape == (2, 8, OUT)
    assert jnp.allclose(y_small, ref(x_small), atol=1e-4, rtol=1e-4), "fast path mismatch"

    # 2) Pallas kernel path (forced): batch=2, seq=512 -> 1024 rows -> packed
    #    (256, 128) input, two 128-row grid steps on the parallel axis.
    x_med = jax.random.normal(kx2, (2, 512, IN), dtype=jnp.float32)
    mod_pallas = EnergyProfiledLinear(weight, bias, name="linear", enabled=True,
                                      min_rows_for_pallas=0)
    y_med = jax.block_until_ready(mod_pallas(x_med))
    assert y_med.shape == (2, 512, OUT)
    assert jnp.allclose(y_med, ref(x_med), atol=1e-4, rtol=1e-4), "pallas path mismatch"

    # 3) Pallas kernel with row padding (M=18, padded to 32 then sliced back).
    x_odd = jax.random.normal(kx1, (2, 9, IN), dtype=jnp.float32)
    y_odd = jax.block_until_ready(mod_pallas(x_odd))
    assert y_odd.shape == (2, 9, OUT)
    assert jnp.allclose(y_odd, ref(x_odd), atol=1e-4, rtol=1e-4), "padded path mismatch"

    # 4) Disabled path: exact zeros, correct shape/dtype, no kernel launch.
    mod_off = EnergyProfiledLinear(weight, bias, name="linear", enabled=False)
    y_off = jax.block_until_ready(mod_off(x_med))
    assert y_off.shape == (2, 512, OUT)
    assert jnp.all(y_off == 0.0), "disabled path must return exact zeros"
    assert y_off.dtype == y_med.dtype

    print("KERNEL_OK")
</pallas_src>

<mosaic_0001>
module attributes {stable_mosaic.version = 11 : i64} {
  func.func @_linear_kernel(%arg0: i32, %arg1: memref<128x128xf32, #tpu.memory_space<vmem>>, %arg2: memref<128x128xf32, #tpu.memory_space<vmem>>, %arg3: memref<1x128xf32, #tpu.memory_space<vmem>>, %arg4: memref<128x128xf32, #tpu.memory_space<vmem>>) attributes {dimension_semantics = [#tpu.dimension_semantics<parallel>], iteration_bounds = array<i64: 2>, scalar_prefetch = 0 : i64, scratch_operands = 0 : i64, tpu.core_type = #tpu.core_type<tc>, window_params = [{transform_indices = @transform_0, window_bounds = array<i64: 128, 128>}, {pipeline_mode = #tpu.pipeline_mode<synchronous>, transform_indices = @transform_1, window_bounds = array<i64: 128, 128>}, {pipeline_mode = #tpu.pipeline_mode<synchronous>, transform_indices = @transform_2, window_bounds = array<i64: 1, 128>}, {transform_indices = @transform_3, window_bounds = array<i64: 128, 128>}]} {
    %c0 = arith.constant 0 : index
    %c0_0 = arith.constant 0 : index
    %0 = vector.load %arg1[%c0, %c0_0] : memref<128x128xf32, #tpu.memory_space<vmem>>, vector<128x128xf32>
    %c0_1 = arith.constant 0 : index
    %c0_2 = arith.constant 0 : index
    %1 = vector.load %arg2[%c0_1, %c0_2] : memref<128x128xf32, #tpu.memory_space<vmem>>, vector<128x128xf32>
    %cst = arith.constant dense<0.000000e+00> : vector<128x128xf32>
    %2 = tpu.matmul %0, %1, %cst {dimension_numbers = #tpu.dot_dimension_numbers<[1], [0], [0], [1], [0, 0, 1, 1], [], []>} : vector<128x128xf32>, vector<128x128xf32>, vector<128x128xf32> -> vector<128x128xf32>
    %c0_3 = arith.constant 0 : index
    %c0_4 = arith.constant 0 : index
    %3 = vector.load %arg3[%c0_3, %c0_4] : memref<1x128xf32, #tpu.memory_space<vmem>>, vector<1x128xf32>
    %4 = vector.broadcast %3 : vector<1x128xf32> to vector<128x128xf32>
    %5 = arith.addf %2, %4 : vector<128x128xf32>
    %c0_5 = arith.constant 0 : index
    %c0_6 = arith.constant 0 : index
    %6 = vector.load %arg4[%c0_5, %c0_6] : memref<128x128xf32, #tpu.memory_space<vmem>>, vector<128x128xf32>
    tpu.vector_store %arg4[%c0_5, %c0_6], %5 {strides = array<i32>} : memref<128x128xf32, #tpu.memory_space<vmem>>, vector<128x128xf32>,
    return
  }
  func.func @transform_0(%arg0: i32) -> (i32, i32) {
    %c0_i32 = arith.constant 0 : i32
    %c0_i32_0 = arith.constant 0 : i32
    return %arg0, %c0_i32 : i32, i32
  }
  func.func @transform_1(%arg0: i32) -> (i32, i32) {
    %c0_i32 = arith.constant 0 : i32
    %c0_i32_0 = arith.constant 0 : i32
    %c0_i32_1 = arith.constant 0 : i32
    return %c0_i32, %c0_i32_0 : i32, i32
  }
  func.func @transform_2(%arg0: i32) -> (i32, i32) {
    %c0_i32 = arith.constant 0 : i32
    %c0_i32_0 = arith.constant 0 : i32
    %c0_i32_1 = arith.constant 0 : i32
    return %c0_i32, %c0_i32_0 : i32, i32
  }
  func.func @transform_3(%arg0: i32) -> (i32, i32) {
    %c0_i32 = arith.constant 0 : i32
    %c0_i32_0 = arith.constant 0 : i32
    return %arg0, %c0_i32 : i32, i32
  }
}

</mosaic_0001>

<bundles_post_ra>
// kernel: tpu_custom_call.1
= control target key start
LH: loop header
LB: loop body
LE: loop exit
PB: predicated region body
PF: predicated region fallthrough
CT: control target
= control target key end

     0   :  { %8 = vsyncpa [#allocation3], 0  ;;  %s899_s0 = inlined_call_operand.hbm [shape: f32[256,128], index: 0, kind: input, shape index: {}]   ;;  %s900_s1 = inlined_call_operand.hbm [shape: f32[128,128], index: 1, kind: input, shape index: {}]   ;;  %s901_s2 = inlined_call_operand.vmem [shape: f32[1,128], index: 2, kind: input, shape index: {}]   ;;  %s902_s3 = inlined_call_operand.hbm [shape: f32[256,128], index: 3, kind: output, shape index: {}]  }
   0x1   :  { %10 = vsyncpa [#allocation3 + $0x1], 0 }
   0x2   :  { %11 = vsyncpa [#allocation6], 0 }
   0x3   :  { %12 = vsyncpa [#allocation4], 0 }
   0x4   :  { %14 = vsyncpa [#allocation4 + $0x1], 0  ;;  %s711_s12 = smov 0   ;;  %s713_s13 = smov 0  }
   0x5   :  { %s715_s14 = smov 0   ;;  %s717_s15 = smov 0  }
   0x6 LB: > { %s732_s16 = sadd.s32 4294967295, %s684_s15   ;;  %s426_s17 = sadd.s32 4294967294, %s684_s15   ;;  %s684_s15 = sphi %s717_s15, %s912_s15   ;;  %s680_s14 = sphi %s715_s14, %s911_s14   ;;  %s676_s13 = sphi %s713_s13, %s910_s13   ;;  %s672_s12 = sphi %s711_s12, %s909_s12  }
   0x7   : > { %p40_p0 = scmp.ne.s32.totalorder %s676_s13, %s672_s12  ;;  %p41_p1 = scmp.eq.s32.totalorder %s732_s16, 0 }
   0x8   : > { %p106_p2 = scmp.eq.s32.totalorder %s732_s16, 1  ;;  %p112_p3 = scmp.eq.s32.totalorder %s426_s17, 1 }
   0x9   : > { %p741_p4 = por %p41_p1, %p40_p0  ;;  %p427_p5 = scmp.ge.s32.totalorder %s684_s15, 1 }
   0xa   : > { %p746_p6 = por %p112_p3, %p40_p0  ;;  %p119_p7 = scmp.lt.s32.totalorder %s684_s15, 3 }
   0xb   : > { %s130_s22 = sshll.u32 %s900_s1, 4  ;;  %s686_s24 = smov [#allocation5]   ;;  %s131_s22 = int_to_ptr.hbm [resolvable:$true] %s130_s22 }
   0xc   : > { %p754_p8 = pnand %p427_p5, %p119_p7  ;;  %s132_s25 = sshll.u32 %s686_s24, 4  ;;  %s133_s25 = int_to_ptr.vmem [resolvable:$true] %s132_s25 }
   0xd   : > { %s764_s26 = sadd.s32 1, %s684_s15   ;;  %s687_s27 = smov 128  }
   0xe   : > { %p500_p9 = pneg %p754_p8  ;;  %s688_s28 = smov 8  }
   0xf   : > { %s24_s29 = ssub.s32 %s684_s15, %s764_s26  ;;  %s27_s30 = sadd.s32 1, %s680_s14 }
  0x10   : > { %p501_p10 = pnand %p500_p9, %p41_p1  ;;  %p25_p12 = scmp.eq.s32.totalorder %s24_s29, 0 }
  0x11   : > { %p34_p13 = scmp.ne.s32.totalorder %s680_s14, %s676_s13  ;;  %p35_p0 = scmp.eq.s32.totalorder %s684_s15, 0 }
  0x12   : > { %503 = dma.hbm_to_vmem [thread:$0]  (!%p501_p10), %s131_s22, 2048, %s133_s25, [#allocation6], %s687_s27, %s687_s27, %s688_s28  }
  0x13   : > { %s776_s4 = scalar_select %p25_p12, %s680_s14, %s27_s30  }
  0x14   : > { %p780_p3 = por %p106_p2, %p34_p13  ;;  %p513_p5 = scmp.lt.s32.totalorder %s684_s15, 2 }
  0x15   : > { %s149_s6 = sand.u32 1, %s680_s14   ;;  %s442_s7 = sshll.u32 %s684_s15, 7 }
  0x16   : > { %p36_p7 = por %p35_p0, %p34_p13  ;;  %s430_s8 = sshll.u32 %s149_s6, 7 }
  0x17   : > { %s158_s11 = scalar_lea.hbm %s899_s0, %s442_s7  ;;  %s153_s20 = scalar_lea.vmem [#allocation2], %s430_s8 }
  0x18   : > { %s159_s17 = sshll.u32 %s158_s11, 4  ;;  %s161_s21 = sshll.u32 %s153_s20, 4  ;;  %s160_s17 = int_to_ptr.hbm [resolvable:$true] %s159_s17  ;;  %s162_s21 = int_to_ptr.vmem [resolvable:$true] %s161_s21 }
  0x19   : > { %p790_p9 = pnand %p513_p5, %p36_p7  ;;  %s150_s24 = scalar_lea.sflag [#allocation3], %s149_s6 }
  0x1a   : > { %s584_s25 = sshra.s32 %s160_s17, 4  ;;  %s591_s8 = scalar_lea.hbm %s899_s0, 256  ;;  %s585_s25 = int_to_ptr.hbm [resolvable:$true] %s584_s25 }
  0x1b   : > { %s586_s29 = scalar_lea.hbm %s585_s25, 128  ;;  %p588_p10 = pneg %p790_p9 }
  0x1c   : > { %p587_p2 = scmp.ne.s32.totalorder %s585_s25, %s586_s29  ;;  %p592_p0 = scmp.lt.s32.totalorder %s585_s25, %s899_s0 }
  0x1d   : > { %p593_p5 = scmp.lt.s32.totalorder %s591_s8, %s586_s29 }
  0x1e   : > { %p589_p12 = pnand %p588_p10, %p587_p2 }
  0x1f   : > { %p594_p7 = por %p593_p5, %p592_p0 }
  0x20   : > { %p590_p13 = pneg %p589_p12 }
  0x22   : > { %p595_p11 = pnand %p594_p7, %p590_p13 }
  0x24   : > { %598 = shalt.err (!%p595_p11)
}
  0x25   : > { %507 = dma.hbm_to_vmem [thread:$0]  (!%p790_p9), %s160_s17, 2048, %s162_s21, %s150_s24, %s687_s27, %s687_s27, %s688_s28  }
  0x26   : > { %173 = sbr.rel (%p754_p8) target bundleno = 241 (0xf1), region = 32  ;;  %s810_s6 = sand.u32 (!%p754_p8), 1, %s676_s13  }
  0x27   : > { %s434_s11 = sshll.u32 (!%p754_p8), %s810_s6, 7  ;;  %s176_s20 = scalar_lea.sflag (!%p754_p8), [#allocation3], %s810_s6 }
  0x28   : > { %s816_s25 = scalar_lea.vmem (!%p754_p8), [#allocation2], %s434_s11 }
  0x2b   : > { %659 = dma.done.wait (%p741_p4), %s176_s20, 2048  }
  0x2c   : > { %661 = vsyncadd (%p741_p4), %s176_s20, 4294965248 }
  0x2d   : > { %663 = dma.done.wait (%p41_p1), [#allocation6], 2048  }
  0x2e   : > { %665 = vsyncadd (%p41_p1), [#allocation6], 4294965248  ;;  %v241_v0 = vld [vmem:[#allocation5 + $0x78] sm:$0xff]  ;;  %v240_v1 = vld [vmem:[#allocation5 + $0x70] sm:$0xff]  ;;  %s847_s27 = scalar_lea.vmem [#allocation7], %s434_s11  ;;  %s443_s28 = sshll.u32 %s732_s16, 7 }
  0x2f   : > { %445 = vmatpush.msra.mxu2 %v241_v0  ;;  %446 = vmatpush.msra.mxu3 %v241_v0  ;;  %v239_v2 = vld [vmem:[#allocation5 + $0x68] sm:$0xff]  ;;  %v238_v3 = vld [vmem:[#allocation5 + $0x60] sm:$0xff]  ;;  %v237_v4 = vld [vmem:[#allocation5 + $0x58] sm:$0xff]  ;;  %s339_s22 = scalar_lea.hbm %s902_s3, %s443_s28  ;;  %s340_s24 = sshll.u32 %s847_s27, 4  ;;  %s341_s24 = int_to_ptr.vmem [resolvable:$true] %s340_s24 }
  0x30   : > { %246 = vmatpush.msra.mxu0 %v241_v0  ;;  %444 = vmatpush.msra.mxu1 %v241_v0  ;;  %v236_v5 = vld [vmem:[#allocation5 + $0x50] sm:$0xff]  ;;  %v235_v6 = vld [vmem:[#allocation5 + $0x48] sm:$0xff]  ;;  %v234_v7 = vld [vmem:[#allocation5 + $0x40] sm:$0xff]  ;;  %s342_s29 = sshll.u32 %s339_s22, 4  ;;  %s328_s16 = scalar_lea.sflag [#allocation4], %s810_s6  ;;  %s343_s29 = int_to_ptr.hbm [resolvable:$true] %s342_s29 }
  0x31   : > { %448 = vmatpush.msra.mxu2 %v240_v1  ;;  %449 = vmatpush.msra.mxu3 %v240_v1  ;;  %v233_v8 = vld [vmem:[#allocation5 + $0x38] sm:$0xff]  ;;  %v232_v9 = vld [vmem:[#allocation5 + $0x30] sm:$0xff]  ;;  %v231_v10 = vld [vmem:[#allocation5 + $0x28] sm:$0xff]  ;;  %s628_s30 = sshra.s32 %s343_s29, 4  ;;  %s634_s10 = scalar_lea.hbm %s902_s3, 256  ;;  %s629_s30 = int_to_ptr.hbm [resolvable:$true] %s628_s30 }
  0x32   : > { %247 = vmatpush.msra.mxu0 %v240_v1  ;;  %447 = vmatpush.msra.mxu1 %v240_v1  ;;  %v230_v11 = vld [vmem:[#allocation5 + $0x20] sm:$0xff]  ;;  %v229_v12 = vld [vmem:[#allocation5 + $0x18] sm:$0xff]  ;;  %v228_v13 = vld [vmem:[#allocation5 + $0x10] sm:$0xff]  ;;  %s630_s7 = scalar_lea.hbm %s629_s30, 128  ;;  %p635_p11 = scmp.lt.s32.totalorder %s629_s30, %s902_s3 }
  0x33   : > { %451 = vmatpush.msra.mxu2 %v239_v2  ;;  %452 = vmatpush.msra.mxu3 %v239_v2  ;;  %v227_v14 = vld [vmem:[#allocation5 + $0x8] sm:$0xff]  ;;  %v226_v15 = vld [vmem:[#allocation5] sm:$0xff]  ;;  %v220_v24 = vld [vmem:[%s816_s25 + $0x50] sm:$0xff]  ;;  %p631_p1 = scmp.ne.s32.totalorder %s629_s30, %s630_s7  ;;  %p636_p9 = scmp.lt.s32.totalorder %s634_s10, %s630_s7 }
  0x34   : > { %248 = vmatpush.msra.mxu0 %v239_v2  ;;  %450 = vmatpush.msra.mxu1 %v239_v2  ;;  %v218_v16 = vld [vmem:[%s816_s25 + $0x40] sm:$0xff]  ;;  %v219_v20 = vld [vmem:[%s816_s25 + $0x48] sm:$0xff]  ;;  %v224_v25 = vld [vmem:[%s816_s25 + $0x70] sm:$0xff] }
  0x35   : > { %454 = vmatpush.msra.mxu2 %v238_v3  ;;  %455 = vmatpush.msra.mxu3 %v238_v3  ;;  %v222_v17 = vld [vmem:[%s816_s25 + $0x60] sm:$0xff]  ;;  %v223_v21 = vld [vmem:[%s816_s25 + $0x68] sm:$0xff]  ;;  %v212_v26 = vld [vmem:[%s816_s25 + $0x10] sm:$0xff]  ;;  %p632_p4 = pnand %p631_p1, %p780_p3  ;;  %p637_p2 = por %p636_p9, %p635_p11 }
  0x36   : > { %249 = vmatpush.msra.mxu0 %v238_v3  ;;  %453 = vmatpush.msra.mxu1 %v238_v3  ;;  %v210_v18 = vld [vmem:[%s816_s25] sm:$0xff]  ;;  %v211_v22 = vld [vmem:[%s816_s25 + $0x8] sm:$0xff]  ;;  %v216_v27 = vld [vmem:[%s816_s25 + $0x30] sm:$0xff] }
  0x37   : > { %457 = vmatpush.msra.mxu2 %v237_v4  ;;  %458 = vmatpush.msra.mxu3 %v237_v4  ;;  %v214_v19 = vld [vmem:[%s816_s25 + $0x20] sm:$0xff]  ;;  %v215_v23 = vld [vmem:[%s816_s25 + $0x28] sm:$0xff]  ;;  %v221_v28 = vld [vmem:[%s816_s25 + $0x58] sm:$0xff]  ;;  %p633_p8 = pneg %p632_p4 }
  0x38   : > { %250 = vmatpush.msra.mxu0 %v237_v4  ;;  %456 = vmatpush.msra.mxu1 %v237_v4  ;;  %v225_v29 = vld [vmem:[%s816_s25 + $0x78] sm:$0xff]  ;;  %v553_v32 = vld [vmem:[%s901_s2] ss:$0 sm:$0xff] }
  0x39   : > { %460 = vmatpush.msra.mxu2 %v236_v5  ;;  %461 = vmatpush.msra.mxu3 %v236_v5  ;;  %v213_v30 = vld [vmem:[%s816_s25 + $0x18] sm:$0xff]  ;;  %p638_p10 = pnand %p637_p2, %p633_p8 }
  0x3a   : > { %251 = vmatpush.msra.mxu0 %v236_v5  ;;  %459 = vmatpush.msra.mxu1 %v236_v5  ;;  %v217_v31 = vld [vmem:[%s816_s25 + $0x38] sm:$0xff] }
  0x3b   : > { %463 = vmatpush.msra.mxu2 %v235_v6  ;;  %464 = vmatpush.msra.mxu3 %v235_v6 }
  0x3c   : > { %252 = vmatpush.msra.mxu0 %v235_v6  ;;  %462 = vmatpush.msra.mxu1 %v235_v6 }
  0x3d   : > { %466 = vmatpush.msra.mxu2 %v234_v7  ;;  %467 = vmatpush.msra.mxu3 %v234_v7 }
  0x3e   : > { %253 = vmatpush.msra.mxu0 %v234_v7  ;;  %465 = vmatpush.msra.mxu1 %v234_v7 }
  0x3f   : > { %469 = vmatpush.msra.mxu2 %v233_v8  ;;  %470 = vmatpush.msra.mxu3 %v233_v8 }
  0x40   : > { %254 = vmatpush.msra.mxu0 %v233_v8  ;;  %468 = vmatpush.msra.mxu1 %v233_v8 }
  0x41   : > { %472 = vmatpush.msra.mxu2 %v232_v9  ;;  %473 = vmatpush.msra.mxu3 %v232_v9 }
  0x42   : > { %255 = vmatpush.msra.mxu0 %v232_v9  ;;  %471 = vmatpush.msra.mxu1 %v232_v9 }
  0x43   : > { %475 = vmatpush.msra.mxu2 %v231_v10  ;;  %476 = vmatpush.msra.mxu3 %v231_v10 }
  0x44   : > { %256 = vmatpush.msra.mxu0 %v231_v10  ;;  %474 = vmatpush.msra.mxu1 %v231_v10 }
  0x45   : > { %478 = vmatpush.msra.mxu2 %v230_v11  ;;  %479 = vmatpush.msra.mxu3 %v230_v11 }
  0x46   : > { %257 = vmatpush.msra.mxu0 %v230_v11  ;;  %477 = vmatpush.msra.mxu1 %v230_v11 }
  0x47   : > { %481 = vmatpush.msra.mxu2 %v229_v12  ;;  %482 = vmatpush.msra.mxu3 %v229_v12 }
  0x48   : > { %258 = vmatpush.msra.mxu0 %v229_v12  ;;  %480 = vmatpush.msra.mxu1 %v229_v12 }
  0x49   : > { %484 = vmatpush.msra.mxu2 %v228_v13  ;;  %485 = vmatpush.msra.mxu3 %v228_v13 }
  0x4a   : > { %259 = vmatpush.msra.mxu0 %v228_v13  ;;  %483 = vmatpush.msra.mxu1 %v228_v13 }
  0x4b   : > { %487 = vmatpush.msra.mxu2 %v227_v14  ;;  %488 = vmatpush.msra.mxu3 %v227_v14 }
  0x4c   : > { %260 = vmatpush.msra.mxu0 %v227_v14  ;;  %486 = vmatpush.msra.mxu1 %v227_v14 }
  0x4d   : > { %490 = vmatpush.msra.mxu2 %v226_v15  ;;  %491 = vmatpush.msra.mxu3 %v226_v15 }
  0x4e   : > { %286 = vmatmul.f32.vlgmr.msra.gmra.mxu2 %v218_v16  ;;  %298 = vmatmul.f32.vlgmr.msra.gmra.mxu3 %v222_v17 }
  0x4f   : > { %261 = vmatpush.msra.mxu0 %v226_v15  ;;  %489 = vmatpush.msra.mxu1 %v226_v15 }
  0x50   : > { %262 = vmatmul.f32.vlgmr.msra.gmra.mxu0 %v210_v18  ;;  %274 = vmatmul.f32.vlgmr.msra.gmra.mxu1 %v214_v19 }
  0x56   : > { %289 = vmatmul.f32.gmra.mxu2 %v219_v20  ;;  %301 = vmatmul.f32.gmra.mxu3 %v223_v21 }
  0x58   : > { %265 = vmatmul.f32.gmra.mxu0 %v211_v22  ;;  %277 = vmatmul.f32.gmra.mxu1 %v215_v23 }
  0x5e   : > { %292 = vmatmul.f32.gmra.mxu2 %v220_v24  ;;  %304 = vmatmul.f32.gmra.mxu3 %v224_v25 }
  0x60   : > { %268 = vmatmul.f32.gmra.mxu0 %v212_v26  ;;  %280 = vmatmul.f32.gmra.mxu1 %v216_v27 }
  0x66   : > { %295 = vmatmul.f32.gmra.mxu2 %v221_v28  ;;  %307 = vmatmul.f32.gmra.mxu3 %v225_v29 }
  0x68   : > { %271 = vmatmul.f32.gmra.mxu0 %v213_v30  ;;  %283 = vmatmul.f32.gmra.mxu1 %v217_v31 }
  0xcd   : > { %v263_v33 = vpop.f32.mrf.mxu0  ;;  %v275_v34 = vpop.f32.mrf.mxu1 }
  0xce   : > { %v264_v35 = vadd.f32 %v553_v32, %v263_v33  ;;  %v276_v36 = vadd.f32 %v553_v32, %v275_v34 }
  0xd0   : > { %311 = vst [vmem:[%s847_s27] sm:$0xff] %v264_v35 }
  0xd1   : > { %315 = vst [vmem:[%s847_s27 + $0x20] sm:$0xff] %v276_v36  ;;  %v287_v37 = vpop.f32.mrf.mxu2  ;;  %v299_v38 = vpop.f32.mrf.mxu3 }
  0xd2   : > { %v288_v39 = vadd.f32 %v553_v32, %v287_v37  ;;  %v300_v40 = vadd.f32 %v553_v32, %v299_v38 }
  0xd4   : > { %319 = vst [vmem:[%s847_s27 + $0x40] sm:$0xff] %v288_v39 }
  0xd5   : > { %323 = vst [vmem:[%s847_s27 + $0x60] sm:$0xff] %v300_v40  ;;  %v266_v41 = vpop.f32.mrf.mxu0  ;;  %v278_v42 = vpop.f32.mrf.mxu1 }
  0xd6   : > { %v267_v43 = vadd.f32 %v553_v32, %v266_v41  ;;  %v279_v44 = vadd.f32 %v553_v32, %v278_v42 }
  0xd8   : > { %312 = vst [vmem:[%s847_s27 + $0x8] sm:$0xff] %v267_v43 }
  0xd9   : > { %316 = vst [vmem:[%s847_s27 + $0x28] sm:$0xff] %v279_v44  ;;  %v290_v45 = vpop.f32.mrf.mxu2  ;;  %v302_v46 = vpop.f32.mrf.mxu3 }
  0xda   : > { %v291_v47 = vadd.f32 %v553_v32, %v290_v45  ;;  %v303_v48 = vadd.f32 %v553_v32, %v302_v46 }
  0xdc   : > { %320 = vst [vmem:[%s847_s27 + $0x48] sm:$0xff] %v291_v47 }
  0xdd   : > { %324 = vst [vmem:[%s847_s27 + $0x68] sm:$0xff] %v303_v48  ;;  %v269_v49 = vpop.f32.mrf.mxu0  ;;  %v281_v50 = vpop.f32.mrf.mxu1 }
  0xde   : > { %v270_v51 = vadd.f32 %v553_v32, %v269_v49  ;;  %v282_v52 = vadd.f32 %v553_v32, %v281_v50 }
  0xe0   : > { %313 = vst [vmem:[%s847_s27 + $0x10] sm:$0xff] %v270_v51 }
  0xe1   : > { %317 = vst [vmem:[%s847_s27 + $0x30] sm:$0xff] %v282_v52  ;;  %v293_v53 = vpop.f32.mrf.mxu2  ;;  %v305_v54 = vpop.f32.mrf.mxu3 }
  0xe2   : > { %v294_v55 = vadd.f32 %v553_v32, %v293_v53  ;;  %v306_v56 = vadd.f32 %v553_v32, %v305_v54 }
  0xe4   : > { %321 = vst [vmem:[%s847_s27 + $0x50] sm:$0xff] %v294_v55 }
  0xe5   : > { %325 = vst [vmem:[%s847_s27 + $0x70] sm:$0xff] %v306_v56  ;;  %v272_v57 = vpop.f32.mrf.mxu0  ;;  %v284_v58 = vpop.f32.mrf.mxu1 }
  0xe6   : > { %v273_v59 = vadd.f32 %v553_v32, %v272_v57  ;;  %v285_v60 = vadd.f32 %v553_v32, %v284_v58 }
  0xe8   : > { %314 = vst [vmem:[%s847_s27 + $0x18] sm:$0xff] %v273_v59 }
  0xe9   : > { %318 = vst [vmem:[%s847_s27 + $0x38] sm:$0xff] %v285_v60  ;;  %v296_v61 = vpop.f32.mrf.mxu2  ;;  %v308_v62 = vpop.f32.mrf.mxu3 }
  0xea   : > { %v297_v63 = vadd.f32 %v553_v32, %v296_v61  ;;  %v309_v0 = vadd.f32 %v553_v32, %v308_v62 }
  0xec   : > { %322 = vst [vmem:[%s847_s27 + $0x58] sm:$0xff] %v297_v63 }
  0xed   : > { %326 = vst [vmem:[%s847_s27 + $0x78] sm:$0xff] %v309_v0 }
  0xee   : > { %641 = shalt.err (!%p638_p10)
}
  0xef   : > { %s689_s6 = smov 128   ;;  %s690_s25 = smov 8  }
  0xf0   : > { %498 = dma.vmem_to_hbm [thread:$0]  (%p780_p3), %s341_s24, 2048, %s343_s29, %s328_s16, %s689_s6, %s689_s6, %s690_s25  }
  0xf1 PF: > { %s357_s18 = sand.u32 1, %s672_s12   ;;  %p908_p12 = scmp.ge.s32.totalorder %s684_s15, 2 }
  0xf2   : > { %s358_s23 = scalar_lea.sflag [#allocation4], %s357_s18 }
  0xf3   : > { %p509_p13 = pnand %p908_p12, %p746_p6 }
  0xf5   : > { %p510_p0 = pneg %p509_p13 }
  0xf7   : > { %667 = dma.done.wait (%p510_p0), %s358_s23, 2048  }
  0xf8   : > { %669 = vsyncadd (%p510_p0), %s358_s23, 4294965248  ;;  %p17_p5 = scmp.ge.s32.totalorder %s764_s26, 4   ;;  %s909_s12 = smov %s676_s13 }
  0xf9   : > { %s910_s13 = smov %s680_s14  ;;  %s911_s14 = smov %s776_s4 }
  0xfa   : > { %s912_s15 = smov %s764_s26  ;;  %19 = sbr.rel (!%p17_p5) target bundleno = 6 (0x6), region = 81 }
  0xff   :  { %364 = vsyncpa [#allocation3], 1 }
 0x100   :  { %366 = vsyncpa [#allocation3 + $0x1], 1 }
 0x101   :  { %367 = vsyncpa [#allocation6], 1 }
 0x102   :  { %368 = vsyncpa [#allocation4], 1 }
 0x103   :  { %370 = vsyncpa [#allocation4 + $0x1], 1 }

</bundles_post_ra>
